<compile_context>
chip_gen: v7x
topology: tpu7x:2x2x1
jax: 0.10.0
libtpu: 0.0.40
codegen_flags: <defaults>
</compile_context>

<pallas_src>
import jax
import jax.numpy as jnp
from jax import lax
from jax.experimental import pallas as pl
from jax.experimental.pallas import tpu as pltpu

_COLS = 128        # lane width; full second dim -> every block is a contiguous HBM chunk
_NUM_CORES = 2     # leading "parallel" grid axis; shards row-blocks across the 2 TCs on v7x


def _round_up(a, b):
    return ((a + b - 1) // b) * b


def _make_focal_kernel(n_valid, tile_r, steps_per_core, needs_mask):
    tile_elems = tile_r * _COLS

    def kernel(x_ref, y_ref, o_ref):
        c = pl.program_id(0)          # core split
        i = pl.program_id(1)          # row-block within this core's range

        # Per-core resident (8,128) partial-sum accumulator (= the output block).
        @pl.when(i == 0)
        def _init():
            o_ref[...] = jnp.zeros_like(o_ref)

        # Narrow HBM dtypes (bf16 / int8) cast to f32 for compute (v5e-safe, accurate sum).
        x = x_ref[...].astype(jnp.float32)
        y = y_ref[...].astype(jnp.float32)

        # Numerically stable BCE-with-logits (same formula PyTorch uses):
        #   bce(x, y) = max(x, 0) - x*y + log1p(exp(-|x|))
        bce = jnp.maximum(x, 0.0) - x * y + jnp.log1p(jnp.exp(-jnp.abs(x)))

        def accumulate(vals):
            # (tile_r,128) -> (tile_r//8, 8, 128) is tile-aligned (free); the axis-0
            # sum is vreg-wise VPU adds only (no XLU reduce, no scalar chain per step).
            o_ref[...] += jnp.sum(vals.reshape(tile_r // 8, 8, _COLS), axis=0)

        if not needs_mask:
            accumulate(bce)
        else:
            # Unclamped global block index and the number of valid elements it holds.
            b = c * steps_per_core + i
            thr = n_valid - b * tile_elems

            @pl.when(thr >= tile_elems)      # interior blocks: no mask work at all
            def _full():
                accumulate(bce)

            @pl.when(thr < tile_elems)       # tail / phantom blocks only
            def _tail():
                row = lax.broadcasted_iota(jnp.int32, (tile_r, _COLS), 0)
                col = lax.broadcasted_iota(jnp.int32, (tile_r, _COLS), 1)
                flat = row * _COLS + col
                # select (not multiply): padded zeros / stale-VMEM NaNs cannot leak in.
                accumulate(jnp.where(flat < thr, bce, 0.0))

    return kernel


def focal_loss(inputs, targets, alpha=1.0, gamma=2.0, tile_rows=4096):
    """Pallas TPU focal loss.

    inputs : logits, any shape (size-1 dims dropped like torch .squeeze()).
    targets: labels of any real / bool / int dtype with the same element count.
    Returns a scalar float32 loss.
    """
    assert tile_rows % 32 == 0  # multiple of native sublane tile for f32/bf16/int8

    x = jnp.squeeze(inputs)     # mimic torch .squeeze()
    y = targets
    if y.dtype == jnp.bool_:
        y = y.astype(jnp.int8)  # keep the HBM stream narrow, avoid i1 blocks
    assert x.size == y.size, (x.shape, y.shape)

    n = int(x.size)
    x = x.reshape(-1)
    y = y.reshape(-1)

    # Only pad when n is not lane-aligned (rare for segmentation shapes); otherwise the
    # reshape below is a free bitcast and no HBM copy is made.
    # TODO(synk): stream the ragged <128-element tail without the copying pad.
    pad = (-n) % _COLS
    if pad:
        x = jnp.pad(x, (0, pad))
        y = jnp.pad(y, (0, pad))
    rows = (n + pad) // _COLS

    tile_r = min(tile_rows, _round_up(rows, 32))
    tile_elems = tile_r * _COLS
    nblocks = -(-rows // tile_r)                       # ceil
    steps = -(-nblocks // _NUM_CORES)                  # row-blocks per core
    covered = _NUM_CORES * steps * tile_elems
    needs_mask = (covered != n)                        # tail / pad / phantom blocks exist

    x2 = x.reshape(rows, _COLS)
    y2 = y.reshape(rows, _COLS)

    def in_map(c, i):
        b = c * steps + i
        # Clamp phantom blocks (odd nblocks / tiny inputs) onto the last real block;
        # the kernel masks their contribution to exactly zero.
        return (jnp.minimum(b, nblocks - 1), 0)

    kernel = _make_focal_kernel(n, tile_r, steps, needs_mask)

    partials = pl.pallas_call(
        kernel,
        out_shape=jax.ShapeDtypeStruct((_NUM_CORES * 8, _COLS), jnp.float32),
        grid=(_NUM_CORES, steps),
        in_specs=[
            pl.BlockSpec((tile_r, _COLS), in_map),
            pl.BlockSpec((tile_r, _COLS), in_map),
        ],
        out_specs=pl.BlockSpec((8, _COLS), lambda c, i: (c, 0)),
        compiler_params=pltpu.CompilerParams(
            dimension_semantics=("parallel", "arbitrary"),
            vmem_limit_bytes=48 * 1024 * 1024),
    )(x2, y2)

    # Scalar epilogue in XLA: combine the per-core (8,128) partial sums, take the mean,
    # apply the focal modulation. alpha/gamma are now arbitrary runtime floats.
    bce_mean = jnp.sum(partials) / n
    pt = 1.0 - jnp.exp(-bce_mean)
    return alpha * pt ** gamma * bce_mean


def _reference_focal_loss(inputs, targets, alpha=1.0, gamma=2.0):
    x = jnp.squeeze(inputs).astype(jnp.float32).reshape(-1)
    y = targets.astype(jnp.float32).reshape(-1)
    bce_elem = jnp.maximum(x, 0.0) - x * y + jnp.log1p(jnp.exp(-jnp.abs(x)))
    bce = jnp.mean(bce_elem)
    return alpha * (1.0 - jnp.exp(-bce)) ** gamma * bce


if __name__ == "__main__":
    key = jax.random.PRNGKey(0)
    k1, k2, k3, k4 = jax.random.split(key, 4)

    # Case 1: NCHW logits with singleton channel (binary segmentation), f32.
    B, C, H, W = 2, 1, 16, 16
    inputs = jax.random.normal(k1, (B, C, H, W), dtype=jnp.float32)
    targets = (jax.random.uniform(k2, (B, H, W)) > 0.5).astype(jnp.float32)

    loss = jax.block_until_ready(focal_loss(inputs, targets))
    ref = jax.block_until_ready(_reference_focal_loss(inputs, targets))
    assert jnp.allclose(loss, ref, rtol=1e-5, atol=1e-6), (loss, ref)

    # Case 2: narrow dtypes (bf16 logits / int8 targets) and a row count that leaves a
    # partial final block -> exercises the masked-tail + phantom-block path.
    B2, H2, W2 = 2, 32, 40
    inputs2 = jax.random.normal(k3, (B2, 1, H2, W2), dtype=jnp.bfloat16)
    targets2 = (jax.random.uniform(k4, (B2, H2, W2)) > 0.5).astype(jnp.int8)

    loss2 = jax.block_until_ready(focal_loss(inputs2, targets2))
    ref2 = jax.block_until_ready(_reference_focal_loss(inputs2, targets2))
    assert jnp.allclose(loss2, ref2, rtol=1e-4, atol=1e-5), (loss2, ref2)

    print("KERNEL_OK")
</pallas_src>

<mosaic_0001>
module attributes {stable_mosaic.version = 11 : i64} {
  func.func @kernel(%arg0: i32, %arg1: i32, %arg2: memref<32x128xf32, #tpu.memory_space<vmem>>, %arg3: memref<32x128xf32, #tpu.memory_space<vmem>>, %arg4: memref<8x128xf32, #tpu.memory_space<vmem>>) attributes {dimension_semantics = [#tpu.dimension_semantics<parallel>, #tpu.dimension_semantics<arbitrary>], iteration_bounds = array<i64: 2, 1>, scalar_prefetch = 0 : i64, scratch_operands = 0 : i64, tpu.core_type = #tpu.core_type<tc>, window_params = [{transform_indices = @transform_0, window_bounds = array<i64: 32, 128>}, {transform_indices = @transform_1, window_bounds = array<i64: 32, 128>}, {transform_indices = @transform_2, window_bounds = array<i64: 8, 128>}]} {
    %c0_i32 = arith.constant 0 : i32
    %0 = arith.cmpi eq, %arg1, %c0_i32 : i32
    %1 = arith.extui %0 : i1 to i32
    %c0_i32_0 = arith.constant 0 : i32
    %2 = arith.cmpi ne, %1, %c0_i32_0 : i32
    scf.if %2 {
      %cst_9 = arith.constant 0.000000e+00 : f32
      %25 = vector.broadcast %cst_9 : f32 to vector<8x128xf32>
      %c0_10 = arith.constant 0 : index
      %c0_11 = arith.constant 0 : index
      %26 = vector.load %arg4[%c0_10, %c0_11] : memref<8x128xf32, #tpu.memory_space<vmem>>, vector<8x128xf32>
      tpu.vector_store %arg4[%c0_10, %c0_11], %25 {strides = array<i32>} : memref<8x128xf32, #tpu.memory_space<vmem>>, vector<8x128xf32>,
    } else {
    }
    %c0 = arith.constant 0 : index
    %c0_1 = arith.constant 0 : index
    %3 = vector.load %arg2[%c0, %c0_1] : memref<32x128xf32, #tpu.memory_space<vmem>>, vector<32x128xf32>
    %c0_2 = arith.constant 0 : index
    %c0_3 = arith.constant 0 : index
    %4 = vector.load %arg3[%c0_2, %c0_3] : memref<32x128xf32, #tpu.memory_space<vmem>>, vector<32x128xf32>
    %cst = arith.constant 0.000000e+00 : f32
    %5 = vector.broadcast %cst : f32 to vector<32x128xf32>
    %6 = arith.maximumf %3, %5 : vector<32x128xf32>
    %7 = arith.mulf %3, %4 : vector<32x128xf32>
    %8 = arith.subf %6, %7 : vector<32x128xf32>
    %9 = math.absf %3 : vector<32x128xf32>
    %cst_4 = arith.constant 0.000000e+00 : f32
    %10 = vector.broadcast %cst_4 : f32 to vector<32x128xf32>
    %11 = arith.subf %10, %9 : vector<32x128xf32>
    %12 = math.exp %11 : vector<32x128xf32>
    %13 = math.log1p %12 : vector<32x128xf32>
    %14 = arith.addf %8, %13 : vector<32x128xf32>
    %c1_i32 = arith.constant 1 : i32
    %15 = arith.muli %arg0, %c1_i32 : i32
    %16 = arith.addi %15, %arg1 : i32
    %c4096_i32 = arith.constant 4096 : i32
    %17 = arith.muli %16, %c4096_i32 : i32
    %c512_i32 = arith.constant 512 : i32
    %18 = arith.subi %c512_i32, %17 : i32
    %c4096_i32_5 = arith.constant 4096 : i32
    %19 = arith.cmpi sge, %18, %c4096_i32_5 : i32
    %20 = arith.extui %19 : i1 to i32
    %c0_i32_6 = arith.constant 0 : i32
    %21 = arith.cmpi ne, %20, %c0_i32_6 : i32
    scf.if %21 {
      %c0_9 = arith.constant 0 : index
      %c0_10 = arith.constant 0 : index
      %25 = vector.load %arg4[%c0_9, %c0_10] : memref<8x128xf32, #tpu.memory_space<vmem>>, vector<8x128xf32>
      %26 = vector.shape_cast %14 : vector<32x128xf32> to vector<4x8x128xf32>
      %cst_11 = arith.constant dense<0.000000e+00> : vector<8x128xf32>
      %27 = vector.multi_reduction <add>, %26, %cst_11 [0] : vector<4x8x128xf32> to vector<8x128xf32>
      %28 = arith.addf %25, %27 : vector<8x128xf32>
      %c0_12 = arith.constant 0 : index
      %c0_13 = arith.constant 0 : index
      %29 = vector.load %arg4[%c0_12, %c0_13] : memref<8x128xf32, #tpu.memory_space<vmem>>, vector<8x128xf32>
      tpu.vector_store %arg4[%c0_12, %c0_13], %28 {strides = array<i32>} : memref<8x128xf32, #tpu.memory_space<vmem>>, vector<8x128xf32>,
    } else {
    }
    %c4096_i32_7 = arith.constant 4096 : i32
    %22 = arith.cmpi slt, %18, %c4096_i32_7 : i32
    %23 = arith.extui %22 : i1 to i32
    %c0_i32_8 = arith.constant 0 : i32
    %24 = arith.cmpi ne, %23, %c0_i32_8 : i32
    scf.if %24 {
      %25 = tpu.iota {dimensions = array<i32: 0>} : vector<32x128xi32>
      %26 = tpu.iota {dimensions = array<i32: 1>} : vector<32x128xi32>
      %c128_i32 = arith.constant 128 : i32
      %27 = vector.broadcast %c128_i32 : i32 to vector<32x128xi32>
      %28 = arith.muli %25, %27 : vector<32x128xi32>
      %29 = arith.addi %28, %26 : vector<32x128xi32>
      %30 = vector.broadcast %18 : i32 to vector<32x128xi32>
      %31 = arith.cmpi slt, %29, %30 : vector<32x128xi32>
      %cst_9 = arith.constant 0.000000e+00 : f32
      %32 = vector.broadcast %cst_9 : f32 to vector<32x128xf32>
      %33 = arith.select %31, %14, %32 : vector<32x128xi1>, vector<32x128xf32>
      %c0_10 = arith.constant 0 : index
      %c0_11 = arith.constant 0 : index
      %34 = vector.load %arg4[%c0_10, %c0_11] : memref<8x128xf32, #tpu.memory_space<vmem>>, vector<8x128xf32>
      %35 = vector.shape_cast %33 : vector<32x128xf32> to vector<4x8x128xf32>
      %cst_12 = arith.constant dense<0.000000e+00> : vector<8x128xf32>
      %36 = vector.multi_reduction <add>, %35, %cst_12 [0] : vector<4x8x128xf32> to vector<8x128xf32>
      %37 = arith.addf %34, %36 : vector<8x128xf32>
      %c0_13 = arith.constant 0 : index
      %c0_14 = arith.constant 0 : index
      %38 = vector.load %arg4[%c0_13, %c0_14] : memref<8x128xf32, #tpu.memory_space<vmem>>, vector<8x128xf32>
      tpu.vector_store %arg4[%c0_13, %c0_14], %37 {strides = array<i32>} : memref<8x128xf32, #tpu.memory_space<vmem>>, vector<8x128xf32>,
    } else {
    }
    return
  }
  func.func @transform_0(%arg0: i32, %arg1: i32) -> (i32, i32) {
    %c1_i32 = arith.constant 1 : i32
    %0 = arith.muli %arg0, %c1_i32 : i32
    %1 = arith.addi %0, %arg1 : i32
    %c0_i32 = arith.constant 0 : i32
    %2 = arith.minsi %1, %c0_i32 : i32
    %c0_i32_0 = arith.constant 0 : i32
    %c0_i32_1 = arith.constant 0 : i32
    return %2, %c0_i32_0 : i32, i32
  }
  func.func @transform_1(%arg0: i32, %arg1: i32) -> (i32, i32) {
    %c1_i32 = arith.constant 1 : i32
    %0 = arith.muli %arg0, %c1_i32 : i32
    %1 = arith.addi %0, %arg1 : i32
    %c0_i32 = arith.constant 0 : i32
    %2 = arith.minsi %1, %c0_i32 : i32
    %c0_i32_0 = arith.constant 0 : i32
    %c0_i32_1 = arith.constant 0 : i32
    return %2, %c0_i32_0 : i32, i32
  }
  func.func @transform_2(%arg0: i32, %arg1: i32) -> (i32, i32) {
    %c0_i32 = arith.constant 0 : i32
    %c0_i32_0 = arith.constant 0 : i32
    return %arg0, %c0_i32 : i32, i32
  }
}

</mosaic_0001>

<bundles_post_ra>
// kernel: tpu_custom_call.1
= control target key start
LH: loop header
LB: loop body
LE: loop exit
PB: predicated region body
PF: predicated region fallthrough
CT: control target
= control target key end

     0   :  { %7 = vsyncpa [#allocation3], 0  ;;  %s1032_s0 = inlined_call_operand.hbm [shape: f32[4,128], index: 0, kind: input, shape index: {}]   ;;  %s1033_s1 = inlined_call_operand.hbm [shape: f32[4,128], index: 1, kind: input, shape index: {}]   ;;  %s1034_s2 = inlined_call_operand.hbm [shape: f32[16,128], index: 2, kind: output, shape index: {}]  }
   0x1   :  { %9 = vsyncpa [#allocation3 + $0x1], 0 }
   0x2   :  { %10 = vsyncpa [#allocation6], 0 }
   0x3   :  { %12 = vsyncpa [#allocation6 + $0x1], 0 }
   0x4   :  { %13 = vsyncpa [#allocation4], 0 }
   0x5   :  { %15 = vsyncpa [#allocation4 + $0x1], 0  ;;  %s820_s9 = smov 0   ;;  %s822_s10 = smov 0  }
   0x6   :  { %s824_s11 = smov 0   ;;  %s826_s12 = smov 0  }
   0x7   :  { %s828_s13 = smov 0   ;;  %s830_s14 = smov 0  }
   0x8   :  { %s832_s15 = smov 0   ;;  %s834_s16 = smov 0  }
   0x9 LB: > { %s495_s17 = sadd.s32 4294967295, %s795_s16   ;;  %s496_s18 = sadd.s32 4294967294, %s795_s16   ;;  %s795_s16 = sphi %s834_s16, %s21_s16   ;;  %s791_s15 = sphi %s832_s15, %s1050_s15   ;;  %s787_s14 = sphi %s830_s14, %s1049_s14   ;;  %s783_s13 = sphi %s828_s13, %s1022_s13   ;;  %s779_s12 = sphi %s826_s12, %s1048_s12   ;;  %s775_s11 = sphi %s824_s11, %s1047_s11   ;;  %s771_s10 = sphi %s822_s10, %s1046_s10   ;;  %s767_s9 = sphi %s820_s9, %s1045_s9  }
   0xa   : > { %s33_s19 = sadd.s32 1, %s791_s15  ;;  %p764_p1 = scmp.ne.s32.totalorder %s783_s13, 0 }
   0xb   : > { %p35_p0 = scmp.ge.s32.totalorder %s33_s19, 2  ;;  %p54_p2 = scmp.eq.s32.totalorder %s795_s16, 0 }
   0xc   : > { %p59_p3 = scmp.ne.s32.totalorder %s783_s13, %s779_s12  ;;  %p60_p5 = scmp.eq.s32.totalorder %s495_s17, 0 }
   0xd   : > { %s1052_s19 = smov (%p35_p0, %s33_s19), 0  ;;  %p866_p4 = por %p764_p1, %p54_p2 }
   0xe   : > { %p870_p6 = por %p60_p5, %p59_p3  ;;  %s101_s22 = ssub.s32 %s791_s15, %s1052_s19 }
   0xf   : > { %p102_p7 = scmp.eq.s32.totalorder %s101_s22, 0  ;;  %s104_s23 = sadd.s32 1, %s775_s11 }
  0x10   : > { %p114_p8 = scmp.ne.s32.totalorder %s775_s11, %s771_s10  ;;  %p115_p9 = scmp.eq.s32.totalorder %s495_s17, 1 }
  0x11   : > { %s878_s24 = scalar_select %p102_p7, %s775_s11, %s104_s23  }
  0x12   : > { %p120_p10 = scmp.ne.s32.totalorder %s771_s10, %s767_s9  ;;  %p121_p11 = scmp.eq.s32.totalorder %s496_s18, 1 }
  0x13   : > { %p884_p12 = por %p115_p9, %p114_p8  ;;  %p1035_p0 = scmp.ge.s32.totalorder %s795_s16, 2 }
  0x14   : > { %p888_p13 = por %p121_p11, %p120_p10 }
  0x15   : > { %137 = sbr.rel (%p1035_p0) target bundleno = 82 (0x52), region = 16 }
  0x1c   : > { %140 = sbr.rel (!%p866_p4) target bundleno = 55 (0x37), region = 20 }
  0x23   : > { %154 = vsyncadd [#allocation3], 448  ;;  %s797_s27 = smov [#allocation2]   ;;  %s628_s3 = scalar_lea.hbm %s1032_s0, 64 }
  0x24   : > { %s159_s28 = sshll.u32 %s797_s27, 4  ;;  %p629_p1 = scmp.ne.s32.totalorder %s1032_s0, %s628_s3  ;;  %s160_s28 = int_to_ptr.vmem [resolvable:$true] %s159_s28 }
  0x25   : > { %p634_p2 = scmp.lt.u32.totalorder %s628_s3, %s628_s3  ;;  %p636_p3 = scmp.lt.u32.totalorder %s628_s3, %s1032_s0 }
  0x27   : > { %p637_p5 = por %p636_p3, %p634_p2 }
  0x29   : > { %p638_p7 = pnand %p637_p5, %p629_p1 }
  0x2b   : > { %641 = shalt.err (!%p638_p7)
}
  0x2c   : > { %s642_s8 = scalar_lea.vmem %s160_s28, 64  ;;  %s648_s12 = scalar_lea.vmem %s160_s28, 1024 }
  0x2d   : > { %p643_p8 = scmp.ne.s32.totalorder %s160_s28, %s642_s8  ;;  %p649_p9 = scmp.lt.s32.totalorder %s160_s28, %s160_s28 }
  0x2e   : > { %p650_p10 = scmp.lt.s32.totalorder %s648_s12, %s642_s8 }
  0x30   : > { %p651_p11 = por %p650_p10, %p649_p9 }
  0x32   : > { %p652_p0 = pnand %p651_p11, %p643_p8 }
  0x34   : > { %655 = shalt.err (!%p652_p0)
}
  0x35   : > { %s798_s17 = smov 64   ;;  %s799_s18 = smov 4  }
  0x36   : > { %165 = dma.hbm_to_vmem [thread:$0]  %s1032_s0, 64, %s160_s28, [#allocation3], %s798_s17, %s798_s17, %s799_s18  }
  0x37 PF: > { %168 = sbr.rel (!%p866_p4) target bundleno = 82 (0x52), region = 24 }
  0x3e   : > { %182 = vsyncadd [#allocation6], 448  ;;  %s800_s27 = smov [#allocation5]   ;;  %s656_s4 = scalar_lea.hbm %s1033_s1, 64 }
  0x3f   : > { %s187_s29 = sshll.u32 %s800_s27, 4  ;;  %p657_p0 = scmp.ne.s32.totalorder %s1033_s1, %s656_s4  ;;  %s188_s29 = int_to_ptr.vmem [resolvable:$true] %s187_s29 }
  0x40   : > { %p662_p1 = scmp.lt.u32.totalorder %s656_s4, %s656_s4  ;;  %p664_p2 = scmp.lt.u32.totalorder %s656_s4, %s1033_s1 }
  0x42   : > { %p665_p3 = por %p664_p2, %p662_p1 }
  0x44   : > { %p666_p5 = pnand %p665_p3, %p657_p0 }
  0x46   : > { %669 = shalt.err (!%p666_p5)
}
  0x47   : > { %s670_s20 = scalar_lea.vmem %s188_s29, 64  ;;  %s676_s28 = scalar_lea.vmem %s188_s29, 1024 }
  0x48   : > { %p671_p4 = scmp.ne.s32.totalorder %s188_s29, %s670_s20  ;;  %p677_p7 = scmp.lt.s32.totalorder %s188_s29, %s188_s29 }
  0x49   : > { %p678_p8 = scmp.lt.s32.totalorder %s676_s28, %s670_s20 }
  0x4b   : > { %p679_p9 = por %p678_p8, %p677_p7 }
  0x4d   : > { %p680_p10 = pnand %p679_p9, %p671_p4 }
  0x4f   : > { %683 = shalt.err (!%p680_p10)
}
  0x50   : > { %s801_s12 = smov 64   ;;  %s802_s17 = smov 4  }
  0x51   : > { %193 = dma.hbm_to_vmem [thread:$0]  %s1033_s1, 64, %s188_s29, [#allocation6], %s801_s12, %s801_s12, %s802_s17  }
  0x52 PF: > { %p513_p11 = scmp.ge.s32.totalorder %s795_s16, 1  ;;  %p195_p0 = scmp.lt.s32.totalorder %s795_s16, 3 }
  0x54   : > { %p196_p1 = pnand %p513_p11, %p195_p0 }
  0x55   : > { %s201_s23 = sand.u32 (!%p196_p1), 1, %s783_s13  }
  0x56   : > { %199 = sbr.rel (%p196_p1) target bundleno = 188 (0xbc), region = 28  ;;  %s514_s27 = sshll.u32 (!%p196_p1), %s201_s23, 5 }
  0x57   : > { %s202_s30 = scalar_lea.sflag (!%p196_p1), [#allocation3], %s201_s23  ;;  %s205_s3 = scalar_lea.vmem (!%p196_p1), [#allocation2], %s514_s27 }
  0x5d   : > { %749 = dma.done.wait (%p870_p6), %s202_s30, 512  }
  0x5e   : > { %751 = vsyncadd (%p870_p6), %s202_s30, 4294966784  ;;  %s211_s29 = scalar_lea.sflag [#allocation6], %s201_s23  ;;  %s930_s4 = scalar_lea.vmem [#allocation5], %s514_s27 }
  0x5f   : > { %753 = dma.done.wait (%p870_p6), %s211_s29, 512  }
  0x60   : > { %755 = vsyncadd (%p870_p6), %s211_s29, 4294966784  ;;  %s237_s5 = sand.u32 1, %s771_s10   ;;  %s517_s6 = sshll.u32 %s787_s14, 12  ;;  %v803_v0 = vmov 0.0   ;;  %v257_v1 = vld [vmem:[%s205_s3] sm:$0xff]  ;;  %v258_v2 = vld [vmem:[%s205_s3 + $0x8] sm:$0xff] }
  0x61   : > { %s516_s7 = sshll.u32 %s237_s5, 3  ;;  %s940_s8 = ssub.s32 512, %s517_s6  ;;  %v945_v3 = vld [vmem:[%s205_s3 + $0x10] sm:$0xff]  ;;  %v947_v4 = vld [vmem:[%s205_s3 + $0x18] sm:$0xff]  ;;  %v277_v5 = vand.u32 2147483647, %v257_v1 }
  0x62   : > { %s942_s20 = scalar_lea.vmem [#allocation7], %s516_s7  ;;  %v278_v6 = vand.u32 2147483647, %v258_v2  ;;  %v279_v7 = vand.u32 2147483647, %v945_v3  ;;  %v261_v27 = vld [vmem:[%s930_s4] sm:$0xff] }
  0x63   : > { %256 = vst [vmem:[%s942_s20] sm:$0xff] %v803_v0  ;;  %v280_v8 = vand.u32 2147483647, %v947_v4  ;;  %v281_v9 = vsub.f32 0.0, %v277_v5  ;;  %v262_v29 = vld [vmem:[%s930_s4 + $0x8] sm:$0xff]  ;;  %v263_v30 = vld [vmem:[%s930_s4 + $0x10] sm:$0xff]  ;;  %v264_v33 = vld [vmem:[%s930_s4 + $0x18] sm:$0xff]  ;;  %v269_v35 = vmul.f32 %v261_v27, %v257_v1 }
  0x64   : > { %v282_v10 = vsub.f32 0.0, %v278_v6  ;;  %v283_v11 = vsub.f32 0.0, %v279_v7  ;;  %v265_v34 = vmax.f32 %v257_v1, 0.0  ;;  %v266_v38 = vmax.f32 %v258_v2, 0.0  ;;  %p518_p6 = scmp.lt.s32.totalorder %s940_s8, 4096 }
  0x65   : > { %v284_v12 = vsub.f32 0.0, %v280_v8  ;;  %v285_v13 = vmul.f32 1.442695, %v281_v9  ;;  %v270_v39 = vmul.f32 %v262_v29, %v258_v2  ;;  %v267_v42 = vmax.f32 %v945_v3, 0.0 }
  0x66   : > { %v287_v14 = vmul.f32 1.442695, %v282_v10  ;;  %v289_v15 = vmul.f32 1.442695, %v283_v11  ;;  %v271_v43 = vmul.f32 %v263_v30, %v945_v3  ;;  %v268_v45 = vmax.f32 %v947_v4, 0.0 }
  0x67   : > { %612 = vpow2.f32 %v285_v13  ;;  %v291_v16 = vmul.f32 1.442695, %v284_v12  ;;  %v272_v46 = vmul.f32 %v264_v33, %v947_v4  ;;  %v273_v50 = vsub.f32 %v265_v34, %v269_v35 }
  0x68   : > { %614 = vpow2.f32 %v287_v14  ;;  %v274_v55 = vsub.f32 %v266_v38, %v270_v39  ;;  %v275_v60 = vsub.f32 %v267_v42, %v271_v43 }
  0x69   : > { %616 = vpow2.f32 %v289_v15  ;;  %v276_v2 = vsub.f32 %v268_v45, %v272_v46 }
  0x6a   : > { %618 = vpow2.f32 %v291_v16  ;;  %v340_v13 = vld [vmem:[%s942_s20] sm:$0xff] (!%p518_p6) }
  0x71   : > { %v613_v17 = vpop.eup %612 }
  0x72   : > { %v615_v18 = vpop.eup %614  ;;  %v293_v19 = vadd.f32 1.0, %v613_v17  ;;  %v296_v24 = vmul.f32 -0.5, %v613_v17  ;;  %v299_v36 = vand.u32 2147483647, %v613_v17 }
  0x73   : > { %v617_v20 = vpop.eup %616  ;;  %v302_v21 = vadd.f32 1.0, %v615_v18  ;;  %v305_v25 = vmul.f32 -0.5, %v615_v18  ;;  %v308_v40 = vand.u32 2147483647, %v615_v18 }
  0x74   : > { %v619_v22 = vpop.eup %618  ;;  %620 = vlog2.f32 %v293_v19  ;;  %v311_v23 = vadd.f32 1.0, %v617_v20  ;;  %v314_v28 = vmul.f32 -0.5, %v617_v20  ;;  %v297_v31 = vadd.f32 1.0, %v296_v24 }
  0x75   : > { %622 = vlog2.f32 %v302_v21  ;;  %v320_v26 = vadd.f32 1.0, %v619_v22  ;;  %v323_v32 = vmul.f32 -0.5, %v619_v22  ;;  %v306_v37 = vadd.f32 1.0, %v305_v25 }
  0x76   : > { %624 = vlog2.f32 %v311_v23  ;;  %v315_v41 = vadd.f32 1.0, %v314_v28  ;;  %v317_v44 = vand.u32 2147483647, %v617_v20  ;;  %v298_v47 = vmul.f32 %v613_v17, %v297_v31 }
  0x77   : > { %626 = vlog2.f32 %v320_v26  ;;  %v324_v48 = vadd.f32 1.0, %v323_v32  ;;  %vm959_vm0 = vcmp.lt.f32.partialorder %v299_v36, 0.0004427343  ;;  %v307_v52 = vmul.f32 %v615_v18, %v306_v37 }
  0x78   : > { %v326_v53 = vand.u32 2147483647, %v619_v22  ;;  %vm963_vm1 = vcmp.lt.f32.partialorder %v308_v40, 0.0004427343  ;;  %v316_v58 = vmul.f32 %v617_v20, %v315_v41  ;;  %vm318_vm2 = vcmp.lt.f32.partialorder %v317_v44, 0.0004427343 }
  0x79   : > { %v325_v0 = vmul.f32 %v619_v22, %v324_v48 }
  0x7a   : > { %vm327_vm3 = vcmp.lt.f32.partialorder %v326_v53, 0.0004427343 }
  0x7e   : > { %v621_v49 = vpop.eup %620 }
  0x7f   : > { %v623_v54 = vpop.eup %622  ;;  %v295_v56 = vmul.f32 0.6931472, %v621_v49  ;;  %339 = sbr.rel (%p518_p6) target bundleno = 142 (0x8e), region = 44 }
  0x80   : > { %v625_v59 = vpop.eup %624  ;;  %v304_v61 = vmul.f32 0.6931472, %v623_v54 }
  0x81   : > { %v301_v62 = vsel %vm959_vm0, %v298_v47, %v295_v56  ;;  %v313_v63 = vmul.f32 0.6931472, %v625_v59  ;;  %v627_v1 = vpop.eup %626 }
  0x82   : > { %v310_v3 = vsel %vm963_vm1, %v307_v52, %v304_v61  ;;  %v329_v4 = vadd.f32 %v301_v62, %v273_v50  ;;  %v322_v6 = vmul.f32 0.6931472, %v627_v1 }
  0x83   : > { %v319_v5 = vsel %vm318_vm2, %v316_v58, %v313_v63  ;;  %v330_v7 = vadd.f32 %v310_v3, %v274_v55 }
  0x84   : > { %v331_v8 = vadd.f32 %v319_v5, %v275_v60  ;;  %v328_v9 = vsel %vm327_vm3, %v325_v0, %v322_v6 }
  0x85   : > { %v332_v10 = vadd.f32 %v328_v9, %v276_v2  ;;  %v341_v11 = vadd.f32 (!%p518_p6), %v330_v7, %v329_v4 }
  0x87   : > { %v342_v12 = vadd.f32 %v341_v11, %v331_v8 }
  0x89   : > { %v343_v14 = vadd.f32 %v342_v12, %v332_v10 }
  0x8b   : > { %v344_v15 = vadd.f32 %v343_v14, %v340_v13 }
  0x8d   : > { %345 = vst [vmem:[%s942_s20] sm:$0xff] %v344_v15 }
  0x8e PF: > { %p519_p2 = scmp.ge.s32.totalorder %s940_s8, 4096 }
  0x8f   : > { %v350_v16 = vlaneseq (!%p519_p2)  ;;  %v365_v23 = vstv (!%p519_p2), %s940_s8 }
  0x90   : > { %349 = sbr.rel (%p519_p2) target bundleno = 164 (0xa4), region = 48 }
  0x91   : > { %v351_v17 = vshrl.u32 (!%p519_p2), %v350_v16, 7  ;;  %v356_v18 = vand.u32 (!%p519_p2), 127, %v350_v16 }
  0x93   : > { %v352_v19 = vadd.s32 (!%p519_p2), 8, %v351_v17  ;;  %v353_v20 = vadd.s32 (!%p519_p2), 16, %v351_v17  ;;  %v354_v21 = vadd.s32 (!%p519_p2), 24, %v351_v17  ;;  %v357_v22 = vmul.u32 (!%p519_p2), 128, %v351_v17 }
  0x94   : > { %v374_v37 = vld [vmem:[%s942_s20] sm:$0xff] (!%p519_p2) }
  0x95   : > { %v358_v24 = vmul.u32 (!%p519_p2), 128, %v352_v19  ;;  %v359_v25 = vmul.u32 (!%p519_p2), 128, %v353_v20  ;;  %v361_v26 = vadd.s32 (!%p519_p2), %v357_v22, %v356_v18 }
  0x96   : > { %v360_v27 = vmul.u32 (!%p519_p2), 128, %v354_v21 }
  0x97   : > { %v362_v28 = vadd.s32 %v358_v24, %v356_v18  ;;  %v363_v29 = vadd.s32 %v359_v25, %v356_v18  ;;  %vm366_vm4 = vcmp.lt.s32.totalorder %v361_v26, %v365_v23 }
  0x98   : > { %v364_v30 = vadd.s32 %v360_v27, %v356_v18  ;;  %v370_v31 = vsel %vm366_vm4, %v329_v4, 0.0 }
  0x99   : > { %vm367_vm5 = vcmp.lt.s32.totalorder %v362_v28, %v365_v23  ;;  %vm368_vm6 = vcmp.lt.s32.totalorder %v363_v29, %v365_v23 }
  0x9a   : > { %vm369_vm7 = vcmp.lt.s32.totalorder %v364_v30, %v365_v23  ;;  %v371_v32 = vsel %vm367_vm5, %v330_v7, 0.0  ;;  %v372_v33 = vsel %vm368_vm6, %v331_v8, 0.0 }
  0x9b   : > { %v375_v34 = vadd.f32 %v371_v32, %v370_v31  ;;  %v373_v35 = vsel %vm369_vm7, %v332_v10, 0.0 }
  0x9d   : > { %v376_v36 = vadd.f32 %v375_v34, %v372_v33 }
  0x9f   : > { %v377_v38 = vadd.f32 %v376_v36, %v373_v35 }
  0xa1   : > { %v378_v39 = vadd.f32 %v377_v38, %v374_v37 }
  0xa3   : > { %379 = vst [vmem:[%s942_s20] sm:$0xff] %v378_v39 }
  0xa4 PF: > { %s521_s21 = sshll.u32 %s787_s14, 7  ;;  %s394_s18 = sshll.u32 %s942_s20, 4  ;;  %s395_s18 = int_to_ptr.vmem [resolvable:$true] %s394_s18 }
  0xa5   : > { %s982_s17 = scalar_lea.hbm %s1034_s2, %s521_s21  ;;  %s381_s22 = scalar_lea.sflag [#allocation4], %s237_s5 }
  0xa6   : > { %s684_s23 = scalar_lea.vmem %s395_s18, 128  ;;  %s804_s27 = smov [#allocation7]  }
  0xa7   : > { %p685_p3 = scmp.ne.s32.totalorder %s395_s18, %s684_s23  ;;  %s688_s30 = sshll.u32 %s804_s27, 4  ;;  %s689_s30 = int_to_ptr.vmem [resolvable:$false] %s688_s30 }
  0xa8   : > { %s690_s3 = scalar_lea.vmem %s689_s30, 256  ;;  %p691_p7 = scmp.lt.s32.totalorder %s395_s18, %s689_s30 }
  0xa9   : > { %p686_p5 = pnand %p685_p3, %p884_p12  ;;  %p692_p8 = scmp.lt.s32.totalorder %s690_s3, %s684_s23 }
  0xab   : > { %p687_p4 = pneg %p686_p5  ;;  %p693_p9 = por %p692_p8, %p691_p7 }
  0xad   : > { %p694_p10 = pnand %p693_p9, %p687_p4 }
  0xaf   : > { %697 = shalt.err (!%p694_p10)
}
  0xb0   : > { %s698_s14 = scalar_lea.hbm %s982_s17, 128  ;;  %s702_s5 = scalar_lea.hbm %s1034_s2, 256 }
  0xb1   : > { %p699_p11 = scmp.ne.s32.totalorder %s982_s17, %s698_s14  ;;  %p703_p6 = scmp.lt.u32.totalorder %s982_s17, %s1034_s2 }
  0xb2   : > { %p704_p2 = scmp.lt.u32.totalorder %s702_s5, %s698_s14  ;;  %p706_p5 = scmp.lt.u32.totalorder %s698_s14, %s982_s17 }
  0xb3   : > { %p700_p0 = pnand %p699_p11, %p884_p12 }
  0xb4   : > { %p705_p3 = por %p704_p2, %p703_p6 }
  0xb5   : > { %p701_p1 = pneg %p700_p0 }
  0xb6   : > { %p707_p4 = por %p706_p5, %p705_p3 }
  0xb8   : > { %p708_p7 = pnand %p707_p4, %p701_p1 }
  0xba   : > { %711 = shalt.err (!%p708_p7)
}
  0xbb   : > { %528 = dma.vmem_to_hbm [thread:$0]  (%p884_p12), %s395_s18, 128, %s982_s17, %s381_s22  }
  0xbc PF: > { %s406_s8 = sand.u32 1, %s767_s9   ;;  %p1044_p8 = scmp.ge.s32.totalorder %s795_s16, 2 }
  0xbd   : > { %s407_s20 = scalar_lea.sflag [#allocation4], %s406_s8 }
  0xbe   : > { %p531_p9 = pnand %p1044_p8, %p888_p13 }
  0xc0   : > { %757 = dma.done.wait (!%p531_p9), %s407_s20, 128  }
  0xc1   : > { %759 = vsyncadd (!%p531_p9), %s407_s20, 4294967168  ;;  %s21_s16 = sadd.s32 1, %s795_s16   ;;  %s1045_s9 = smov %s771_s10 }
  0xc2   : > { %p18_p10 = scmp.ge.s32.totalorder %s21_s16, 4   ;;  %s1046_s10 = smov %s775_s11 }
  0xc3   : > { %s1047_s11 = smov %s878_s24  ;;  %s1048_s12 = smov %s783_s13 }
  0xc4   : > { %s1022_s13 = smov 0   ;;  %s1049_s14 = smov %s791_s15 }
  0xc5   : > { %s1050_s15 = smov %s1052_s19  ;;  %20 = sbr.rel (!%p18_p10) target bundleno = 9 (0x9), region = 98 }
  0xcc   :  { %412 = vsyncpa [#allocation3], 1 }
  0xcd   :  { %414 = vsyncpa [#allocation3 + $0x1], 1 }
  0xce   :  { %415 = vsyncpa [#allocation6], 1 }
  0xcf   :  { %417 = vsyncpa [#allocation6 + $0x1], 1 }
  0xd0   :  { %418 = vsyncpa [#allocation4], 1 }
  0xd1   :  { %420 = vsyncpa [#allocation4 + $0x1], 1 }

</bundles_post_ra>
